<compile_context>
chip_gen: v7x
topology: tpu7x:2x2x1
jax: 0.10.0
libtpu: 0.0.40
codegen_flags: <defaults>
</compile_context>

<pallas_src>
import functools

import jax
import jax.numpy as jnp
from jax.experimental import pallas as pl
from jax.experimental.pallas import tpu as pltpu

H1_PAD = 512   # 400 padded up to a multiple of 128
H2_PAD = 384   # 300 padded up to a multiple of 128
A_LANES = 128  # action dim padded up to one full lane group


def _round_up(x, m):
    return ((x + m - 1) // m) * m


def actor_kernel(x_ref, w1_ref, b1_ref, w2_ref, b2_ref, w3_ref, b3_ref, o_ref):
    # Layer 1: Linear(state, 512) + ReLU   (bf16 MXU, f32 accumulate)
    h1 = jnp.dot(x_ref[...].astype(jnp.bfloat16), w1_ref[...],
                 preferred_element_type=jnp.float32)
    h1 = jnp.maximum(h1 + b1_ref[...], 0.0)

    # Layer 2: Linear(512, 384) + ReLU
    h2 = jnp.dot(h1.astype(jnp.bfloat16), w2_ref[...],
                 preferred_element_type=jnp.float32)
    h2 = jnp.maximum(h2 + b2_ref[...], 0.0)

    # Layer 3: Linear(384, 128-padded action) + tanh.  Output lanes are padded
    # to 128 so this store is lane-dense (unmasked vst); padded lanes are
    # tanh(0 + 0) = 0 and get sliced off in the wrapper.
    h3 = jnp.dot(h2.astype(jnp.bfloat16), w3_ref[...],
                 preferred_element_type=jnp.float32)
    o_ref[...] = jnp.tanh(h3 + b3_ref[...]).astype(o_ref.dtype)


@functools.partial(jax.jit, static_argnames=("action_size", "block_b"))
def actor_forward(x, packed_params, *, action_size, block_b=1024):
    """x: (B, state_size) f32 -> (B, action_size) f32."""
    w1, b1, w2, b2, w3, b3 = packed_params
    B, S = x.shape
    Ap = w3.shape[1]          # padded action dim (multiple of 128)

    # Balanced batch tiling:
    #   * >= 2 (even) tiles whenever B >= 16 so a v7x megacore shards the
    #     "parallel" grid axis evenly over both TensorCores,
    #   * tile size from cdiv so padding is always < one tile,
    #   * tile rows rounded up to the sublane multiple (8).
    if B >= 16:
        n_tiles = max(2, pl.cdiv(B, block_b))
        n_tiles = _round_up(n_tiles, 2)
    else:
        n_tiles = 1
    tm = _round_up(pl.cdiv(B, n_tiles), 8)
    b_pad = _round_up(B, tm)
    if b_pad != B:
        x = jnp.pad(x, ((0, b_pad - B), (0, 0)))
    grid = (b_pad // tm,)

    # x / out stream over the batch grid; weights & biases are pinned in VMEM
    # (constant block index => single DMA, resident across all iterations).
    pinned = lambda a: pl.BlockSpec(a.shape, lambda i: (0,) * a.ndim)

    flops = 2 * b_pad * (S * H1_PAD + H1_PAD * H2_PAD + H2_PAD * Ap)
    bytes_accessed = (
        x.size * x.dtype.itemsize
        + sum(p.size * p.dtype.itemsize for p in packed_params)
        + b_pad * Ap * 4
    )
    cost = pl.CostEstimate(flops=flops, transcendentals=b_pad * Ap,
                           bytes_accessed=bytes_accessed)

    out = pl.pallas_call(
        actor_kernel,
        out_shape=jax.ShapeDtypeStruct((b_pad, Ap), jnp.float32),
        grid=grid,
        in_specs=[
            pl.BlockSpec((tm, S), lambda i: (i, 0)),
            pinned(w1), pinned(b1),
            pinned(w2), pinned(b2),
            pinned(w3), pinned(b3),
        ],
        out_specs=pl.BlockSpec((tm, Ap), lambda i: (i, 0)),
        compiler_params=pltpu.CompilerParams(
            dimension_semantics=("parallel",)),
        cost_estimate=cost,
    )(x, w1, b1, w2, b2, w3, b3)

    return out[:B, :action_size]


def init_actor_params(key, state_size, action_size):
    """f32 logical params, PyTorch nn.Linear default init (U[-1/sqrt(fan_in), +])."""
    dims = [(state_size, 400), (400, 300), (300, action_size)]
    params = []
    for i, (fan_in, fan_out) in enumerate(dims):
        kw, kb = jax.random.split(jax.random.fold_in(key, i))
        bound = 1.0 / jnp.sqrt(float(fan_in))
        w = jax.random.uniform(kw, (fan_in, fan_out), jnp.float32, -bound, bound)
        b = jax.random.uniform(kb, (1, fan_out), jnp.float32, -bound, bound)
        params += [w, b]
    return tuple(params)


def pack_actor_params(params):
    """Zero-pad hidden dims to (512, 384), action dim to 128, cast weights bf16.

    Zero padding is exact: padded h1/h2 lanes are ReLU(0 + 0) = 0 and the
    corresponding rows of the next weight are zero; padded output lanes are
    tanh(0) = 0 and are sliced off.  The forward pass is unchanged up to bf16
    weight quantization.
    """
    w1, b1, w2, b2, w3, b3 = params
    s, h1 = w1.shape
    h2 = w2.shape[1]
    a = w3.shape[1]
    a_pad = _round_up(a, A_LANES)

    w1p = jnp.zeros((s, H1_PAD), jnp.float32).at[:, :h1].set(w1)
    b1p = jnp.zeros((1, H1_PAD), jnp.float32).at[:, :h1].set(b1)
    w2p = jnp.zeros((H1_PAD, H2_PAD), jnp.float32).at[:h1, :h2].set(w2)
    b2p = jnp.zeros((1, H2_PAD), jnp.float32).at[:, :h2].set(b2)
    w3p = jnp.zeros((H2_PAD, a_pad), jnp.float32).at[:h2, :a].set(w3)
    b3p = jnp.zeros((1, a_pad), jnp.float32).at[:, :a].set(b3)

    return (w1p.astype(jnp.bfloat16), b1p,
            w2p.astype(jnp.bfloat16), b2p,
            w3p.astype(jnp.bfloat16), b3p)


def _ref_forward_matched(x, packed, action_size):
    """Pure-JAX reference with identical numerics (bf16 MXU inputs, f32 acc)."""
    w1, b1, w2, b2, w3, b3 = packed
    h1 = jnp.maximum(
        jnp.dot(x.astype(jnp.bfloat16), w1, preferred_element_type=jnp.float32) + b1, 0.0)
    h2 = jnp.maximum(
        jnp.dot(h1.astype(jnp.bfloat16), w2, preferred_element_type=jnp.float32) + b2, 0.0)
    h3 = jnp.dot(h2.astype(jnp.bfloat16), w3, preferred_element_type=jnp.float32) + b3
    return jnp.tanh(h3)[:, :action_size]


def _ref_forward_f32(x, params):
    """Unpadded full-f32 reference (the original PyTorch semantics)."""
    w1, b1, w2, b2, w3, b3 = params
    return jnp.tanh(
        jnp.maximum(jnp.maximum(x @ w1 + b1, 0.0) @ w2 + b2, 0.0) @ w3 + b3)


if __name__ == "__main__":
    key = jax.random.PRNGKey(0)
    state_size, action_size = 16, 4

    k_x, k_p = jax.random.split(key)
    params = init_actor_params(k_p, state_size, action_size)
    packed = pack_actor_params(params)

    # batch=8  -> single tile (grid=(1,)), acting-path shape.
    # batch=40 -> two balanced tiles (tm=24, b_pad=48, grid=(2,)): exercises
    #             the multi-tile "parallel" axis and row/lane padding slices.
    for batch in (8, 40):
        x = jax.random.normal(jax.random.fold_in(k_x, batch),
                              (batch, state_size), jnp.float32)
        out = jax.block_until_ready(
            actor_forward(x, packed, action_size=action_size))
        assert out.shape == (batch, action_size)

        # Tight check vs. a numerically-matched reference (bf16 weights, f32 acc).
        ref_bf16 = _ref_forward_matched(x, packed, action_size)
        assert jnp.allclose(out, ref_bf16, atol=1e-5, rtol=1e-5), (
            batch, float(jnp.max(jnp.abs(out - ref_bf16))))

        # Loose semantic check vs. the original full-f32, unpadded forward pass
        # (differences come only from bf16 weight quantization).
        ref_f32 = _ref_forward_f32(x, params)
        assert jnp.allclose(out, ref_f32, atol=5e-2, rtol=5e-2), (
            batch, float(jnp.max(jnp.abs(out - ref_f32))))

    print("KERNEL_OK")
</pallas_src>

<mosaic_0001>
module attributes {stable_mosaic.version = 11 : i64} {
  func.func @actor_kernel(%arg0: i32, %arg1: memref<8x16xf32, #tpu.memory_space<vmem>>, %arg2: memref<16x512xbf16, #tpu.memory_space<vmem>>, %arg3: memref<1x512xf32, #tpu.memory_space<vmem>>, %arg4: memref<512x384xbf16, #tpu.memory_space<vmem>>, %arg5: memref<1x384xf32, #tpu.memory_space<vmem>>, %arg6: memref<384x128xbf16, #tpu.memory_space<vmem>>, %arg7: memref<1x128xf32, #tpu.memory_space<vmem>>, %arg8: memref<8x128xf32, #tpu.memory_space<vmem>>) attributes {dimension_semantics = [#tpu.dimension_semantics<parallel>], iteration_bounds = array<i64: 1>, scalar_prefetch = 0 : i64, scratch_operands = 0 : i64, tpu.core_type = #tpu.core_type<tc>, window_params = [{transform_indices = @transform_0, window_bounds = array<i64: 8, 16>}, {pipeline_mode = #tpu.pipeline_mode<synchronous>, transform_indices = @transform_1, window_bounds = array<i64: 16, 512>}, {pipeline_mode = #tpu.pipeline_mode<synchronous>, transform_indices = @transform_2, window_bounds = array<i64: 1, 512>}, {pipeline_mode = #tpu.pipeline_mode<synchronous>, transform_indices = @transform_3, window_bounds = array<i64: 512, 384>}, {pipeline_mode = #tpu.pipeline_mode<synchronous>, transform_indices = @transform_4, window_bounds = array<i64: 1, 384>}, {pipeline_mode = #tpu.pipeline_mode<synchronous>, transform_indices = @transform_5, window_bounds = array<i64: 384, 128>}, {pipeline_mode = #tpu.pipeline_mode<synchronous>, transform_indices = @transform_6, window_bounds = array<i64: 1, 128>}, {transform_indices = @transform_7, window_bounds = array<i64: 8, 128>}]} {
    %c0 = arith.constant 0 : index
    %c0_0 = arith.constant 0 : index
    %0 = vector.load %arg1[%c0, %c0_0] : memref<8x16xf32, #tpu.memory_space<vmem>>, vector<8x16xf32>
    %1 = arith.truncf %0 : vector<8x16xf32> to vector<8x16xbf16>
    %c0_1 = arith.constant 0 : index
    %c0_2 = arith.constant 0 : index
    %2 = vector.load %arg2[%c0_1, %c0_2] : memref<16x512xbf16, #tpu.memory_space<vmem>>, vector<16x512xbf16>
    %cst = arith.constant dense<0.000000e+00> : vector<8x512xf32>
    %3 = tpu.matmul %1, %2, %cst {dimension_numbers = #tpu.dot_dimension_numbers<[1], [0], [0], [1], [0, 0, 1, 1], [], []>} : vector<8x16xbf16>, vector<16x512xbf16>, vector<8x512xf32> -> vector<8x512xf32>
    %c0_3 = arith.constant 0 : index
    %c0_4 = arith.constant 0 : index
    %4 = vector.load %arg3[%c0_3, %c0_4] : memref<1x512xf32, #tpu.memory_space<vmem>>, vector<1x512xf32>
    %5 = vector.broadcast %4 : vector<1x512xf32> to vector<8x512xf32>
    %6 = arith.addf %3, %5 : vector<8x512xf32>
    %cst_5 = arith.constant 0.000000e+00 : f32
    %7 = vector.broadcast %cst_5 : f32 to vector<8x512xf32>
    %8 = arith.maximumf %6, %7 : vector<8x512xf32>
    %9 = arith.truncf %8 : vector<8x512xf32> to vector<8x512xbf16>
    %c0_6 = arith.constant 0 : index
    %c0_7 = arith.constant 0 : index
    %10 = vector.load %arg4[%c0_6, %c0_7] : memref<512x384xbf16, #tpu.memory_space<vmem>>, vector<512x384xbf16>
    %cst_8 = arith.constant dense<0.000000e+00> : vector<8x384xf32>
    %11 = tpu.matmul %9, %10, %cst_8 {dimension_numbers = #tpu.dot_dimension_numbers<[1], [0], [0], [1], [0, 0, 1, 1], [], []>} : vector<8x512xbf16>, vector<512x384xbf16>, vector<8x384xf32> -> vector<8x384xf32>
    %c0_9 = arith.constant 0 : index
    %c0_10 = arith.constant 0 : index
    %12 = vector.load %arg5[%c0_9, %c0_10] : memref<1x384xf32, #tpu.memory_space<vmem>>, vector<1x384xf32>
    %13 = vector.broadcast %12 : vector<1x384xf32> to vector<8x384xf32>
    %14 = arith.addf %11, %13 : vector<8x384xf32>
    %cst_11 = arith.constant 0.000000e+00 : f32
    %15 = vector.broadcast %cst_11 : f32 to vector<8x384xf32>
    %16 = arith.maximumf %14, %15 : vector<8x384xf32>
    %17 = arith.truncf %16 : vector<8x384xf32> to vector<8x384xbf16>
    %c0_12 = arith.constant 0 : index
    %c0_13 = arith.constant 0 : index
    %18 = vector.load %arg6[%c0_12, %c0_13] : memref<384x128xbf16, #tpu.memory_space<vmem>>, vector<384x128xbf16>
    %cst_14 = arith.constant dense<0.000000e+00> : vector<8x128xf32>
    %19 = tpu.matmul %17, %18, %cst_14 {dimension_numbers = #tpu.dot_dimension_numbers<[1], [0], [0], [1], [0, 0, 1, 1], [], []>} : vector<8x384xbf16>, vector<384x128xbf16>, vector<8x128xf32> -> vector<8x128xf32>
    %c0_15 = arith.constant 0 : index
    %c0_16 = arith.constant 0 : index
    %20 = vector.load %arg7[%c0_15, %c0_16] : memref<1x128xf32, #tpu.memory_space<vmem>>, vector<1x128xf32>
    %21 = vector.broadcast %20 : vector<1x128xf32> to vector<8x128xf32>
    %22 = arith.addf %19, %21 : vector<8x128xf32>
    %23 = math.tanh %22 : vector<8x128xf32>
    %c0_17 = arith.constant 0 : index
    %c0_18 = arith.constant 0 : index
    %24 = vector.load %arg8[%c0_17, %c0_18] : memref<8x128xf32, #tpu.memory_space<vmem>>, vector<8x128xf32>
    tpu.vector_store %arg8[%c0_17, %c0_18], %23 {strides = array<i32>} : memref<8x128xf32, #tpu.memory_space<vmem>>, vector<8x128xf32>,
    return
  }
  func.func @transform_0(%arg0: i32) -> (i32, i32) {
    %c0_i32 = arith.constant 0 : i32
    %c0_i32_0 = arith.constant 0 : i32
    return %arg0, %c0_i32 : i32, i32
  }
  func.func @transform_1(%arg0: i32) -> (i32, i32) {
    %c0_i32 = arith.constant 0 : i32
    %c0_i32_0 = arith.constant 0 : i32
    %c0_i32_1 = arith.constant 0 : i32
    return %c0_i32, %c0_i32_0 : i32, i32
  }
  func.func @transform_2(%arg0: i32) -> (i32, i32) {
    %c0_i32 = arith.constant 0 : i32
    %c0_i32_0 = arith.constant 0 : i32
    %c0_i32_1 = arith.constant 0 : i32
    return %c0_i32, %c0_i32_0 : i32, i32
  }
  func.func @transform_3(%arg0: i32) -> (i32, i32) {
    %c0_i32 = arith.constant 0 : i32
    %c0_i32_0 = arith.constant 0 : i32
    %c0_i32_1 = arith.constant 0 : i32
    return %c0_i32, %c0_i32_0 : i32, i32
  }
  func.func @transform_4(%arg0: i32) -> (i32, i32) {
    %c0_i32 = arith.constant 0 : i32
    %c0_i32_0 = arith.constant 0 : i32
    %c0_i32_1 = arith.constant 0 : i32
    return %c0_i32, %c0_i32_0 : i32, i32
  }
  func.func @transform_5(%arg0: i32) -> (i32, i32) {
    %c0_i32 = arith.constant 0 : i32
    %c0_i32_0 = arith.constant 0 : i32
    %c0_i32_1 = arith.constant 0 : i32
    return %c0_i32, %c0_i32_0 : i32, i32
  }
  func.func @transform_6(%arg0: i32) -> (i32, i32) {
    %c0_i32 = arith.constant 0 : i32
    %c0_i32_0 = arith.constant 0 : i32
    %c0_i32_1 = arith.constant 0 : i32
    return %c0_i32, %c0_i32_0 : i32, i32
  }
  func.func @transform_7(%arg0: i32) -> (i32, i32) {
    %c0_i32 = arith.constant 0 : i32
    %c0_i32_0 = arith.constant 0 : i32
    return %arg0, %c0_i32 : i32, i32
  }
}

</mosaic_0001>

<bundles_post_ra>
// kernel: actor_forward.1
= control target key start
LH: loop header
LB: loop body
LE: loop exit
PB: predicated region body
PF: predicated region fallthrough
CT: control target
= control target key end

     0   :  { %12 = vsyncpa [#allocation3], 0  ;;  %s1970_s0 = inlined_call_operand.hbm [shape: f32[8,16], index: 0, kind: input, shape index: {}]   ;;  %s1971_s1 = inlined_call_operand.hbm [shape: bf16[16,512], index: 1, kind: input, shape index: {}]   ;;  %s1972_s2 = inlined_call_operand.vmem [shape: f32[1,512], index: 2, kind: input, shape index: {}]   ;;  %s1973_s3 = inlined_call_operand.hbm [shape: bf16[512,384], index: 3, kind: input, shape index: {}]   ;;  %s1974_s4 = inlined_call_operand.vmem [shape: f32[1,384], index: 4, kind: input, shape index: {}]   ;;  %s1975_s5 = inlined_call_operand.hbm [shape: bf16[384,128], index: 5, kind: input, shape index: {}]   ;;  %s1976_s6 = inlined_call_operand.vmem [shape: f32[1,128], index: 6, kind: input, shape index: {}]   ;;  %s1977_s7 = inlined_call_operand.vmem [shape: f32[8,128], index: 7, kind: output, shape index: {}]  }
   0x1   :  { %13 = vsyncpa [#allocation5], 0 }
   0x2   :  { %14 = vsyncpa [#allocation8], 0  ;;  %s1830_s24 = smov [#allocation4]   ;;  %s1736_s28 = scalar_lea.hbm %s1971_s1, 512 }
   0x3   :  { %s30_s25 = sshll.u32 %s1830_s24, 4  ;;  %p1737_p0 = scmp.ne.s32.totalorder %s1971_s1, %s1736_s28  ;;  %s31_s25 = int_to_ptr.vmem [resolvable:$true] %s30_s25 }
   0x4   :  { %p1740_p1 = scmp.lt.u32.totalorder %s1736_s28, %s1971_s1 }
   0x6   :  { %p1742_p2 = pnand %p1740_p1, %p1737_p0 }
   0x8   :  { %1745 = shalt.err (!%p1742_p2)
}
   0x9   :  { %s1746_s10 = scalar_lea.vmem %s31_s25, 512  ;;  %p1751_p4 = scmp.lt.s32.totalorder %s31_s25, %s31_s25 }
   0xa   :  { %p1747_p3 = scmp.ne.s32.totalorder %s31_s25, %s1746_s10  ;;  %p1752_p5 = scmp.lt.s32.totalorder %s1746_s10, %s1746_s10 }
   0xc   :  { %p1753_p6 = por %p1752_p5, %p1751_p4 }
   0xe   :  { %p1754_p7 = pnand %p1753_p6, %p1747_p3 }
  0x10   :  { %1757 = shalt.err (!%p1754_p7)
}
  0x11   :  { %s1831_s11 = smov 256   ;;  %s1832_s12 = smov 16  }
  0x12   :  { %36 = dma.hbm_to_vmem [thread:$0]  %s1971_s1, 512, %s31_s25, [#allocation5], %s1831_s11, %s1831_s11, %s1832_s12  }
  0x13   :  { %s1833_s15 = smov [#allocation2]   ;;  %s1834_s17 = smov [#allocation6]  }
  0x14   :  { %s21_s16 = sshll.u32 %s1833_s15, 4  ;;  %s44_s18 = sshll.u32 %s1834_s17, 4  ;;  %s22_s16 = int_to_ptr.vmem [resolvable:$true] %s21_s16  ;;  %s45_s18 = int_to_ptr.vmem [resolvable:$true] %s44_s18 }
  0x15   :  { %s1758_s21 = scalar_lea.hbm %s1970_s0, 128 }
  0x16   :  { %p1759_p8 = scmp.ne.s32.totalorder %s1970_s0, %s1758_s21  ;;  %p1762_p9 = scmp.lt.u32.totalorder %s1758_s21, %s1970_s0 }
  0x18   :  { %p1764_p10 = pnand %p1762_p9, %p1759_p8 }
  0x1a   :  { %1767 = shalt.err (!%p1764_p10)
}
  0x1b   :  { %s1768_s1 = scalar_lea.vmem %s22_s16, 128  ;;  %p1773_p12 = scmp.lt.s32.totalorder %s22_s16, %s22_s16 }
  0x1c   :  { %p1769_p11 = scmp.ne.s32.totalorder %s22_s16, %s1768_s1  ;;  %p1774_p13 = scmp.lt.s32.totalorder %s1768_s1, %s1768_s1 }
  0x1e   :  { %p1775_p0 = por %p1774_p13, %p1773_p12 }
  0x20   :  { %p1776_p1 = pnand %p1775_p0, %p1769_p11 }
  0x22   :  { %1779 = shalt.err (!%p1776_p1)
}
  0x23   :  { %24 = dma.hbm_to_vmem [thread:$0]  %s1970_s0, 128, %s22_s16, [#allocation3]  }
  0x24   :  { %s1780_s30 = scalar_lea.hbm %s1973_s3, 12288 }
  0x25   :  { %p1781_p2 = scmp.ne.s32.totalorder %s1973_s3, %s1780_s30  ;;  %p1784_p3 = scmp.lt.u32.totalorder %s1780_s30, %s1973_s3 }
  0x27   :  { %p1786_p4 = pnand %p1784_p3, %p1781_p2 }
  0x29   :  { %1789 = shalt.err (!%p1786_p4)
}
  0x2a   :  { %s1790_s12 = scalar_lea.vmem %s45_s18, 12288  ;;  %p1795_p6 = scmp.lt.s32.totalorder %s45_s18, %s45_s18 }
  0x2b   :  { %p1791_p5 = scmp.ne.s32.totalorder %s45_s18, %s1790_s12  ;;  %p1796_p7 = scmp.lt.s32.totalorder %s1790_s12, %s1790_s12 }
  0x2d   :  { %p1797_p8 = por %p1796_p7, %p1795_p6 }
  0x2f   :  { %p1798_p9 = pnand %p1797_p8, %p1791_p5 }
  0x31   :  { %1801 = shalt.err (!%p1798_p9)
}
  0x32   :  { %s1835_s0 = smov 192   ;;  %s1836_s13 = smov 12  }
  0x33   :  { %50 = dma.hbm_to_vmem [thread:$0]  %s1973_s3, 12288, %s45_s18, [#allocation5], %s1835_s0, %s1835_s0, %s1836_s13  }
  0x34   :  { %s1837_s16 = smov [#allocation7]   ;;  %s1802_s21 = scalar_lea.hbm %s1975_s5, 3072 }
  0x35   :  { %s58_s17 = sshll.u32 %s1837_s16, 4  ;;  %p1803_p10 = scmp.ne.s32.totalorder %s1975_s5, %s1802_s21  ;;  %s59_s17 = int_to_ptr.vmem [resolvable:$true] %s58_s17 }
  0x36   :  { %p1806_p11 = scmp.lt.u32.totalorder %s1802_s21, %s1975_s5 }
  0x38   :  { %p1808_p12 = pnand %p1806_p11, %p1803_p10 }
  0x3a   :  { %1811 = shalt.err (!%p1808_p12)
}
  0x3b   :  { %s1812_s1 = scalar_lea.vmem %s59_s17, 3072  ;;  %p1817_p0 = scmp.lt.s32.totalorder %s59_s17, %s59_s17 }
  0x3c   :  { %p1813_p13 = scmp.ne.s32.totalorder %s59_s17, %s1812_s1  ;;  %p1818_p1 = scmp.lt.s32.totalorder %s1812_s1, %s1812_s1 }
  0x3e   :  { %p1819_p2 = por %p1818_p1, %p1817_p0 }
  0x40   :  { %p1820_p3 = pnand %p1819_p2, %p1813_p13 }
  0x42   :  { %1823 = shalt.err (!%p1820_p3)
}
  0x43   :  { %s1838_s3 = smov 64   ;;  %s1839_s18 = smov 4  }
  0x44   :  { %64 = dma.hbm_to_vmem [thread:$0]  %s1975_s5, 3072, %s59_s17, [#allocation8], %s1838_s3, %s1838_s3, %s1839_s18  }
  0x45   :  { %1824 = dma.done.wait [#allocation3], 128  }
  0x46   :  { %1825 = vsyncadd [#allocation3], 4294967168 }
  0x47   :  { %1826 = dma.done.wait [#allocation5], 12800  }
  0x48   :  { %1827 = vsyncadd [#allocation5], 4294954496 }
  0x49   :  { %1828 = dma.done.wait [#allocation8], 3072  }
  0x4a   :  { %1829 = vsyncadd [#allocation8], 4294964224  ;;  %v1840_v0 = vmov 0   ;;  %v1576_v1 = vld [vmem:[#allocation4 + $0x4] ss:$16 sps:$4 sm:$0xff]   ;;  %v80_v3 = vld [vmem:[#allocation2] sm:$0xff]  ;;  %v88_v57 = vlaneseq }
  0x4b   :  { %164 = vmatprep.mubr.bf16.mxu0 %v1840_v0  ;;  %205 = vmatprep.mubr.bf16.mxu1 %v1840_v0  ;;  %v1578_v2 = vld [vmem:[#allocation4] ss:$16 sps:$4 sm:$0xff]   ;;  %v81_v4 = vpack.c.bf16 %v80_v3, %v80_v3  ;;  %v1579_v5 = vld [vmem:[#allocation4 + $0xc] ss:$16 sps:$4 sm:$0xff]   ;;  %v1581_v6 = vld [vmem:[#allocation4 + $0x8] ss:$16 sps:$4 sm:$0xff]  }
  0x4c   :  { %132 = vmatprep.subr.bf16.mxu0 %v1576_v1  ;;  %vm128_vm0 = vcmask 130048   ;;  %v1582_v7 = vld [vmem:[#allocation6] ss:$12 sps:$4 sm:$0xff]   ;;  %173 = vmatprep.subr.bf16.mxu1 %v1579_v5  ;;  %v1584_v8 = vld [vmem:[#allocation6 + $0x4] ss:$12 sps:$4 sm:$0xff]   ;;  %v1931_v58 = vshrl.u32 %v88_v57, 7 }
  0x4d   :  { %133 = vmatpush1.bf16.msra.mxu0 %v1578_v2  ;;  %174 = vmatpush1.bf16.msra.mxu1 %v1581_v6  ;;  %v1587_v9 = vld [vmem:[#allocation6 + $0x1c] ss:$12 sps:$4 sm:$0xff]   ;;  %v1585_v10 = vld [vmem:[#allocation6 + $0x18] ss:$12 sps:$4 sm:$0xff]   ;;  %v1590_v11 = vld [vmem:[#allocation6 + $0x34] ss:$12 sps:$4 sm:$0xff]  }
  0x4e   :  { %879 = vmatprep.subr.bf16.mxu0 %v1584_v8  ;;  %v1588_v12 = vld [vmem:[#allocation6 + $0x30] ss:$12 sps:$4 sm:$0xff]   ;;  %v1593_v13 = vld [vmem:[#allocation6 + $0x4c] ss:$12 sps:$4 sm:$0xff]   ;;  %v1591_v14 = vld [vmem:[#allocation6 + $0x48] ss:$12 sps:$4 sm:$0xff]  }
  0x4f   :  { %v1596_v15 = vld [vmem:[#allocation6 + $0x64] ss:$12 sps:$4 sm:$0xff]   ;;  %v1609_v16 = vld [vmem:[#allocation6 + $0xc8] ss:$12 sps:$4 sm:$0xff]   ;;  %v1594_v18 = vld [vmem:[#allocation6 + $0x60] ss:$12 sps:$4 sm:$0xff]  }
  0x50   :  { %1339 = vmatmul.mubr.msk.bf16.vlgmr.msra.gmra.mrb[0].mxu0 %vm128_vm0, %v81_v4  ;;  %1340 = vmatmul.mubr.msk.bf16.vlgmr.msra.gmra.mrb[0].mxu1 %vm128_vm0, %v81_v4  ;;  %v1610_v17 = vld [vmem:[#allocation6 + $0x8] ss:$12 sps:$4 sm:$0xff]   ;;  %v1614_v20 = vld [vmem:[#allocation6 + $0xe0] ss:$12 sps:$4 sm:$0xff]   ;;  %v1597_v22 = vld [vmem:[#allocation6 + $0x78] ss:$12 sps:$4 sm:$0xff]  }
  0x51   :  { %880 = vmatpush1.bf16.msra.mxu0 %v1582_v7  ;;  %1462 = vmatprep.subr.bf16.mxu1 %v1609_v16  ;;  %v1599_v19 = vld [vmem:[#allocation6 + $0x7c] ss:$12 sps:$4 sm:$0xff]   ;;  %v1615_v21 = vld [vmem:[#allocation6 + $0x20] ss:$12 sps:$4 sm:$0xff]   ;;  %v1619_v23 = vld [vmem:[#allocation6 + $0xf8] ss:$12 sps:$4 sm:$0xff]  }
  0x52   :  { %881 = vmatprep.subr.bf16.mxu0 %v1587_v9  ;;  %1463 = vmatpush3.bf16.msra.mxu1 %v1610_v17  ;;  %v1620_v24 = vld [vmem:[#allocation6 + $0x38] ss:$12 sps:$4 sm:$0xff]   ;;  %v1602_v25 = vld [vmem:[#allocation6 + $0x94] ss:$12 sps:$4 sm:$0xff]   ;;  %v1624_v26 = vld [vmem:[#allocation6 + $0x110] ss:$12 sps:$4 sm:$0xff]  }
  0x53   :  { %1464 = vmatprep.subr.bf16.mxu1 %v1614_v20  ;;  %v1625_v27 = vld [vmem:[#allocation6 + $0x50] ss:$12 sps:$4 sm:$0xff]   ;;  %v1605_v29 = vld [vmem:[#allocation6 + $0xac] ss:$12 sps:$4 sm:$0xff]   ;;  %v1629_v30 = vld [vmem:[#allocation6 + $0x128] ss:$12 sps:$4 sm:$0xff]  }
  0x54   :  { %v1600_v28 = vld [vmem:[#allocation6 + $0x90] ss:$12 sps:$4 sm:$0xff]   ;;  %v1630_v31 = vld [vmem:[#allocation6 + $0x68] ss:$12 sps:$4 sm:$0xff]   ;;  %v1634_v34 = vld [vmem:[#allocation6 + $0x140] ss:$12 sps:$4 sm:$0xff]  }
  0x55   :  { %882 = vmatpush1.bf16.msra.mxu0 %v1585_v10  ;;  %v1603_v32 = vld [vmem:[#allocation6 + $0xa8] ss:$12 sps:$4 sm:$0xff]   ;;  %v1608_v33 = vld [vmem:[#allocation6 + $0xc4] ss:$12 sps:$4 sm:$0xff]   ;;  %v1606_v35 = vld [vmem:[#allocation6 + $0xc0] ss:$12 sps:$4 sm:$0xff]  }
  0x56   :  { %883 = vmatprep.subr.bf16.mxu0 %v1590_v11  ;;  %1465 = vmatpush3.bf16.msra.mxu1 %v1615_v21  ;;  %v1635_v36 = vld [vmem:[#allocation6 + $0x80] ss:$12 sps:$4 sm:$0xff]   ;;  %v1613_v37 = vld [vmem:[#allocation6 + $0xdc] ss:$12 sps:$4 sm:$0xff]   ;;  %v1611_v38 = vld [vmem:[#allocation6 + $0xd8] ss:$12 sps:$4 sm:$0xff]  }
  0x57   :  { %1466 = vmatprep.subr.bf16.mxu1 %v1619_v23  ;;  %v1618_v39 = vld [vmem:[#allocation6 + $0xf4] ss:$12 sps:$4 sm:$0xff]   ;;  %v1616_v40 = vld [vmem:[#allocation6 + $0xf0] ss:$12 sps:$4 sm:$0xff]   ;;  %v1623_v41 = vld [vmem:[#allocation6 + $0x10c] ss:$12 sps:$4 sm:$0xff]  }
  0x58   :  { %v1621_v42 = vld [vmem:[#allocation6 + $0x108] ss:$12 sps:$4 sm:$0xff]   ;;  %v1628_v43 = vld [vmem:[#allocation6 + $0x124] ss:$12 sps:$4 sm:$0xff]   ;;  %v1626_v44 = vld [vmem:[#allocation6 + $0x120] ss:$12 sps:$4 sm:$0xff]  }
  0x59   :  { %884 = vmatpush1.bf16.msra.mxu0 %v1588_v12  ;;  %v1633_v45 = vld [vmem:[#allocation6 + $0x13c] ss:$12 sps:$4 sm:$0xff]   ;;  %v1631_v46 = vld [vmem:[#allocation6 + $0x138] ss:$12 sps:$4 sm:$0xff]   ;;  %v1638_v47 = vld [vmem:[#allocation6 + $0x154] ss:$12 sps:$4 sm:$0xff]  }
  0x5a   :  { %885 = vmatprep.subr.bf16.mxu0 %v1593_v13  ;;  %1467 = vmatpush3.bf16.msra.mxu1 %v1620_v24  ;;  %v1639_v48 = vld [vmem:[#allocation6 + $0x158] ss:$12 sps:$4 sm:$0xff]   ;;  %v1636_v49 = vld [vmem:[#allocation6 + $0x150] ss:$12 sps:$4 sm:$0xff]   ;;  %v1641_v53 = vld [vmem:[#allocation6 + $0x168] ss:$12 sps:$4 sm:$0xff]  }
  0x5b   :  { %1468 = vmatprep.subr.bf16.mxu1 %v1624_v26  ;;  %v1640_v50 = vld [vmem:[#allocation6 + $0x98] ss:$12 sps:$4 sm:$0xff]   ;;  %v1644_v52 = vld [vmem:[#allocation6 + $0x170] ss:$12 sps:$4 sm:$0xff]   ;;  %v1649_v56 = vld [vmem:[#allocation6 + $0x248] ss:$12 sps:$4 sm:$0xff]  }
  0x5c   :  { %v1643_v51 = vld [vmem:[#allocation6 + $0x16c] ss:$12 sps:$4 sm:$0xff]   ;;  %v1645_v54 = vld [vmem:[#allocation6 + $0xb0] ss:$12 sps:$4 sm:$0xff]   ;;  %v90_v59 = vsub.s32 0, %v1931_v58  ;;  %v94_v61 = vsub.s32 1, %v1931_v58 }
  0x5d   :  { %886 = vmatpush1.bf16.msra.mxu0 %v1591_v14  ;;  %v1648_v55 = vld [vmem:[#allocation6 + $0x184] ss:$12 sps:$4 sm:$0xff]   ;;  %v1937_v60 = vld [vmem:[%s1972_s2] sm:$0xf]  ;;  %v102_v62 = vsub.s32 3, %v1931_v58  ;;  %vm1842_vm1 = vmmov 0  }
  0x5e   :  { %887 = vmatprep.subr.bf16.mxu0 %v1596_v15  ;;  %1469 = vmatpush3.bf16.msra.mxu1 %v1625_v27  ;;  %v91_v63 = vrot.slane %v1937_v60, %v90_v59  ;;  %v95_v0 = vrot.slane %v1937_v60, %v94_v61  ;;  %v1646_v16 = vld [vmem:[#allocation6 + $0x180] ss:$12 sps:$4 sm:$0xff]   ;;  %v1650_v17 = vld [vmem:[#allocation6 + $0x188] ss:$12 sps:$4 sm:$0xff]   ;;  %v1651_v23 = vld [vmem:[#allocation6 + $0x198] ss:$12 sps:$4 sm:$0xff]  }
  0x5f   :  { %1470 = vmatprep.subr.bf16.mxu1 %v1629_v30  ;;  %v103_v2 = vrot.slane %v1937_v60, %v102_v62  ;;  %v1653_v20 = vld [vmem:[#allocation6 + $0x19c] ss:$12 sps:$4 sm:$0xff]   ;;  %v1654_v21 = vld [vmem:[#allocation6 + $0x260] ss:$12 sps:$4 sm:$0xff]   ;;  %v1659_v26 = vld [vmem:[#allocation6 + $0x278] ss:$12 sps:$4 sm:$0xff]  }
  0x60   :  { %v1655_v24 = vld [vmem:[#allocation6 + $0x1a0] ss:$12 sps:$4 sm:$0xff]   ;;  %v1656_v27 = vld [vmem:[#allocation6 + $0x1b0] ss:$12 sps:$4 sm:$0xff]   ;;  %v1689_v57 = vld [vmem:[#allocation6 + $0x258] ss:$12 sps:$4 sm:$0xff]  }
  0x61   :  { %888 = vmatpush1.bf16.msra.mxu0 %v1594_v18  ;;  %v1664_v30 = vld [vmem:[#allocation6 + $0x290] ss:$12 sps:$4 sm:$0xff]  }
  0x62   :  { %889 = vmatprep.subr.bf16.mxu0 %v1599_v19  ;;  %1471 = vmatpush3.bf16.msra.mxu1 %v1630_v31  ;;  %v1661_v31 = vld [vmem:[#allocation6 + $0x1c8] ss:$12 sps:$4 sm:$0xff]   ;;  %v1692_v62 = vld [vmem:[#allocation6 + $0x270] ss:$12 sps:$4 sm:$0xff]  }
  0x63   :  { %1472 = vmatprep.subr.bf16.mxu1 %v1634_v34  ;;  %v1669_v34 = vld [vmem:[#allocation6 + $0x2a8] ss:$12 sps:$4 sm:$0xff]  }
  0x65   :  { %890 = vmatpush1.bf16.msra.mxu0 %v1597_v22 }
  0x66   :  { %891 = vmatprep.subr.bf16.mxu0 %v1602_v25  ;;  %1473 = vmatpush3.bf16.msra.mxu1 %v1635_v36  ;;  %v1658_v25 = vld [vmem:[#allocation6 + $0x1b4] ss:$12 sps:$4 sm:$0xff]  }
  0x67   :  { %1474 = vmatprep.subr.bf16.mxu1 %v1639_v48  ;;  %v1666_v36 = vld [vmem:[#allocation6 + $0x1e0] ss:$12 sps:$4 sm:$0xff]  }
  0x68   :  { %v1683_v48 = vld [vmem:[#allocation6 + $0x22c] ss:$12 sps:$4 sm:$0xff]  }
  0x69   :  { %892 = vmatpush1.bf16.msra.mxu0 %v1600_v28  ;;  %v1660_v28 = vld [vmem:[#allocation6 + $0x1b8] ss:$12 sps:$4 sm:$0xff]  }
  0x6a   :  { %893 = vmatprep.subr.bf16.mxu0 %v1605_v29  ;;  %1475 = vmatpush3.bf16.msra.mxu1 %v1640_v50  ;;  %v1663_v29 = vld [vmem:[#allocation6 + $0x1cc] ss:$12 sps:$4 sm:$0xff]  }
  0x6b   :  { %1476 = vmatprep.subr.bf16.mxu1 %v1644_v52  ;;  %v1685_v52 = vld [vmem:[#allocation6 + $0x230] ss:$12 sps:$4 sm:$0xff]  }
  0x6d   :  { %894 = vmatpush1.bf16.msra.mxu0 %v1603_v32  ;;  %v1665_v32 = vld [vmem:[#allocation6 + $0x1d0] ss:$12 sps:$4 sm:$0xff]  }
  0x6e   :  { %895 = vmatprep.subr.bf16.mxu0 %v1608_v33  ;;  %1477 = vmatpush3.bf16.msra.mxu1 %v1645_v54  ;;  %v1668_v33 = vld [vmem:[#allocation6 + $0x1e4] ss:$12 sps:$4 sm:$0xff]  }
  0x6f   :  { %1484 = vmatprep.subr.bf16.mxu1 %v1649_v56  ;;  %v1691_v56 = vld [vmem:[#allocation6 + $0x25c] ss:$12 sps:$4 sm:$0xff]  }
  0x71   :  { %896 = vmatpush1.bf16.msra.mxu0 %v1606_v35  ;;  %v98_v35 = vsub.s32 2, %v1931_v58  ;;  %v1728_v58 = vld [vmem:[#allocation7 + $0x90] sm:$0xff]  }
  0x72   :  { %897 = vmatprep.subr.bf16.mxu0 %v1613_v37  ;;  %v1670_v37 = vld [vmem:[#allocation6 + $0x1e8] ss:$12 sps:$4 sm:$0xff]  }
  0x75   :  { %898 = vmatpush1.bf16.msra.mxu0 %v1611_v38  ;;  %v1673_v38 = vld [vmem:[#allocation6 + $0x1fc] ss:$12 sps:$4 sm:$0xff]  }
  0x76   :  { %899 = vmatprep.subr.bf16.mxu0 %v1618_v39  ;;  %v1674_v39 = vld [vmem:[#allocation6 + $0x2c0] ss:$12 sps:$4 sm:$0xff]  }
  0x79   :  { %900 = vmatpush1.bf16.msra.mxu0 %v1616_v40  ;;  %v99_v40 = vrot.slane %v1937_v60, %v98_v35  ;;  %v1694_v60 = vld [vmem:[#allocation6 + $0x274] ss:$12 sps:$4 sm:$0xff]  }
  0x7a   :  { %901 = vmatprep.subr.bf16.mxu0 %v1623_v41  ;;  %v1671_v41 = vld [vmem:[#allocation6 + $0x1f8] ss:$12 sps:$4 sm:$0xff]  }
  0x7d   :  { %902 = vmatpush1.bf16.msra.mxu0 %v1621_v42  ;;  %v1675_v42 = vld [vmem:[#allocation6 + $0x200] ss:$12 sps:$4 sm:$0xff]  }
  0x7e   :  { %903 = vmatprep.subr.bf16.mxu0 %v1628_v43  ;;  %v1678_v43 = vld [vmem:[#allocation6 + $0x214] ss:$12 sps:$4 sm:$0xff]  }
  0x81   :  { %904 = vmatpush1.bf16.msra.mxu0 %v1626_v44  ;;  %v1679_v44 = vld [vmem:[#allocation6 + $0x2d8] ss:$12 sps:$4 sm:$0xff]  }
  0x82   :  { %905 = vmatprep.subr.bf16.mxu0 %v1633_v45 }
  0x85   :  { %906 = vmatpush1.bf16.msra.mxu0 %v1631_v46  ;;  %v1676_v46 = vld [vmem:[#allocation6 + $0x210] ss:$12 sps:$4 sm:$0xff]  }
  0x86   :  { %907 = vmatprep.subr.bf16.mxu0 %v1638_v47  ;;  %v1680_v47 = vld [vmem:[#allocation6 + $0x218] ss:$12 sps:$4 sm:$0xff]  }
  0x89   :  { %908 = vmatpush1.bf16.msra.mxu0 %v1636_v49  ;;  %v1684_v49 = vld [vmem:[#allocation6 + $0x2f0] ss:$12 sps:$4 sm:$0xff]  }
  0x8a   :  { %909 = vmatprep.subr.bf16.mxu0 %v1643_v51  ;;  %v1681_v51 = vld [vmem:[#allocation6 + $0x228] ss:$12 sps:$4 sm:$0xff]  }
  0x8d   :  { %910 = vmatpush1.bf16.msra.mxu0 %v1641_v53  ;;  %v1688_v53 = vld [vmem:[#allocation6 + $0x244] ss:$12 sps:$4 sm:$0xff]  }
  0x8e   :  { %920 = vmatprep.subr.bf16.mxu0 %v1648_v55  ;;  %v1686_v55 = vld [vmem:[#allocation6 + $0x240] ss:$12 sps:$4 sm:$0xff]  }
 0x123   :  { %v166_v1 = vpop.f32.mrb[0].mxu0  ;;  %v1948_v7 = vpop.f32.mrb[0].mxu1 }
 0x124   :  { %v167_v3 = vadd.f32 %v166_v1, %v91_v63  ;;  %v168_v4 = vpop.f32.mrb[1].mxu0  ;;  %v209_v10 = vpop.f32.mrb[1].mxu1  ;;  %v208_v45 = vadd.f32 %v1948_v7, %v99_v40  ;;  %v1697_v63 = vld [vmem:[#allocation6 + $0x28c] ss:$12 sps:$4 sm:$0xff]   ;;  %v1700_v1 = vld [vmem:[#allocation6 + $0x2a4] ss:$12 sps:$4 sm:$0xff]  }
 0x125   :  { %v169_v5 = vadd.f32 %v168_v4, %v95_v0  ;;  %v170_v6 = vpop.f32.mrb[2].mxu0  ;;  %v210_v12 = vadd.f32 %v209_v10, %v103_v2  ;;  %v211_v13 = vpop.f32.mrb[2].mxu1  ;;  %v1695_v0 = vld [vmem:[#allocation6 + $0x288] ss:$12 sps:$4 sm:$0xff]   ;;  %v1698_v2 = vld [vmem:[#allocation6 + $0x2a0] ss:$12 sps:$4 sm:$0xff]  }
 0x126   :  { %v214_v8 = vmax.f32 %v167_v3, 0.0  ;;  %v171_v9 = vpop.f32.mrb[3].mxu0  ;;  %v212_v14 = vpop.f32.mrb[3].mxu1  ;;  %v216_v50 = vmax.f32 %v208_v45, 0.0  ;;  %v1703_v3 = vld [vmem:[#allocation6 + $0x2bc] ss:$12 sps:$4 sm:$0xff]  }
 0x127   :  { %v215_v11 = vmax.f32 %v169_v5, 0.0  ;;  %v217_v18 = vmax.f32 %v210_v12, 0.0  ;;  %v1701_v4 = vld [vmem:[#allocation6 + $0x2b8] ss:$12 sps:$4 sm:$0xff]   ;;  %v1706_v5 = vld [vmem:[#allocation6 + $0x2d4] ss:$12 sps:$4 sm:$0xff]  }
 0x128   :  { %v218_v19 = vpack.c.bf16 %v214_v8, %v214_v8  ;;  %v220_v54 = vpack.c.bf16 %v216_v50, %v216_v50  ;;  %v1704_v6 = vld [vmem:[#allocation6 + $0x2d0] ss:$12 sps:$4 sm:$0xff]   ;;  %v1709_v7 = vld [vmem:[#allocation6 + $0x2ec] ss:$12 sps:$4 sm:$0xff]   ;;  %v1707_v8 = vld [vmem:[#allocation6 + $0x2e8] ss:$12 sps:$4 sm:$0xff]  }
 0x129   :  { %v219_v15 = vpack.c.bf16 %v215_v11, %v215_v11  ;;  %v221_v22 = vpack.c.bf16 %v217_v18, %v217_v18  ;;  %v1710_v9 = vld [vmem:[#allocation7 + $0x40] sm:$0xff]   ;;  %v1712_v11 = vld [vmem:[#allocation7 + $0x48] sm:$0xff]   ;;  %v1714_v13 = vld [vmem:[#allocation7 + $0x50] sm:$0xff]  }
 0x12a   :  { %v1711_v10 = vld [vmem:[#allocation7] sm:$0xff]   ;;  %v1713_v12 = vld [vmem:[#allocation7 + $0x8] sm:$0xff]   ;;  %v1715_v14 = vld [vmem:[#allocation7 + $0x10] sm:$0xff]  }
 0x12b   :  { %911 = vmatprep.mubr.bf16.mxu0 %v219_v15  ;;  %993 = vmatprep.mubr.bf16.mxu1 %v219_v15  ;;  %v1716_v15 = vld [vmem:[#allocation7 + $0x58] sm:$0xff]   ;;  %v1719_v18 = vld [vmem:[#allocation7 + $0x20] sm:$0xff]  }
 0x12c   :  { %912 = vmatmul.mubr.bf16.vlgmr.msra.gmra.mrb[4].mxu0 %v218_v19  ;;  %994 = vmatmul.mubr.bf16.vlgmr.msra.gmra.mrb[4].mxu1 %v218_v19  ;;  %v1720_v19 = vld [vmem:[#allocation7 + $0x68] sm:$0xff]  }
 0x12d   :  { %921 = vmatpush1.bf16.msra.mxu0 %v1646_v16  ;;  %1485 = vmatpush3.bf16.msra.mxu1 %v1650_v17  ;;  %v1717_v16 = vld [vmem:[#allocation7 + $0x18] sm:$0xff]   ;;  %v1718_v17 = vld [vmem:[#allocation7 + $0x60] sm:$0xff]  }
 0x12e   :  { %922 = vmatprep.subr.bf16.mxu0 %v1653_v20  ;;  %1486 = vmatprep.subr.bf16.mxu1 %v1654_v21  ;;  %v1721_v20 = vld [vmem:[#allocation7 + $0x28] sm:$0xff]   ;;  %v1722_v21 = vld [vmem:[#allocation7 + $0x70] sm:$0xff]  }
 0x12f   :  { %1033 = vmatprep.mubr.bf16.mxu1 %v221_v22  ;;  %952 = vmatprep.mubr.bf16.mxu0 %v221_v22  ;;  %v1723_v22 = vld [vmem:[#allocation7 + $0x30] sm:$0xff]  }
 0x131   :  { %923 = vmatpush1.bf16.msra.mxu0 %v1651_v23  ;;  %1487 = vmatpush3.bf16.msra.mxu1 %v1655_v24  ;;  %v1724_v23 = vld [vmem:[#allocation7 + $0x78] sm:$0xff]  }
 0x132   :  { %924 = vmatprep.subr.bf16.mxu0 %v1658_v25  ;;  %1488 = vmatprep.subr.bf16.mxu1 %v1659_v26  ;;  %v1725_v24 = vld [vmem:[#allocation7 + $0x38] sm:$0xff]   ;;  %v1841_v25 = vmov 0.0  }
 0x135   :  { %925 = vmatpush1.bf16.msra.mxu0 %v1656_v27  ;;  %1489 = vmatpush3.bf16.msra.mxu1 %v1660_v28 }
 0x136   :  { %926 = vmatprep.subr.bf16.mxu0 %v1663_v29  ;;  %1490 = vmatprep.subr.bf16.mxu1 %v1664_v30 }
 0x139   :  { %927 = vmatpush1.bf16.msra.mxu0 %v1661_v31  ;;  %1491 = vmatpush3.bf16.msra.mxu1 %v1665_v32  ;;  %v350_v31 = vld [vmem:[%s1974_s4] sm:$0x7] }
 0x13a   :  { %928 = vmatprep.subr.bf16.mxu0 %v1668_v33  ;;  %1492 = vmatprep.subr.bf16.mxu1 %v1669_v34  ;;  %v363_v32 = vrot.slane %v350_v31, %v98_v35 }
 0x13d   :  { %929 = vmatpush1.bf16.msra.mxu0 %v1666_v36  ;;  %1493 = vmatpush3.bf16.msra.mxu1 %v1670_v37 }
 0x13e   :  { %930 = vmatprep.subr.bf16.mxu0 %v1673_v38  ;;  %1494 = vmatprep.subr.bf16.mxu1 %v1674_v39 }
 0x141   :  { %931 = vmatpush1.bf16.msra.mxu0 %v1671_v41  ;;  %1495 = vmatpush3.bf16.msra.mxu1 %v1675_v42  ;;  %v355_v41 = vrot.slane %v350_v31, %v90_v59  ;;  %v359_v42 = vrot.slane %v350_v31, %v94_v61  ;;  %v1729_v59 = vld [vmem:[#allocation7 + $0x98] sm:$0xff]   ;;  %v1730_v61 = vld [vmem:[#allocation7 + $0xa0] sm:$0xff]  }
 0x142   :  { %932 = vmatprep.subr.bf16.mxu0 %v1678_v43  ;;  %1496 = vmatprep.subr.bf16.mxu1 %v1679_v44 }
 0x145   :  { %933 = vmatpush1.bf16.msra.mxu0 %v1676_v46  ;;  %1497 = vmatpush3.bf16.msra.mxu1 %v1680_v47 }
 0x146   :  { %934 = vmatprep.subr.bf16.mxu0 %v1683_v48  ;;  %1498 = vmatprep.subr.bf16.mxu1 %v1684_v49 }
 0x149   :  { %935 = vmatpush1.bf16.msra.mxu0 %v1681_v51  ;;  %1499 = vmatpush3.bf16.msra.mxu1 %v1685_v52  ;;  %v1726_v51 = vld [vmem:[#allocation7 + $0x80] sm:$0xff]  }
 0x14a   :  { %936 = vmatprep.subr.bf16.mxu0 %v1688_v53  ;;  %1506 = vmatprep.subr.bf16.mxu1 %v1710_v9  ;;  %v1727_v53 = vld [vmem:[#allocation7 + $0x88] sm:$0xff]  }
 0x14c   :  { %1034 = vmatmul.mubr.bf16.vlgmr.msra.gmra.mrb[8].mxu1 %v220_v54 }
 0x14d   :  { %937 = vmatpush1.bf16.msra.mxu0 %v1686_v55  ;;  %1507 = vmatpush3.bf16.msra.mxu1 %v1711_v10  ;;  %v1732_v55 = vld [vmem:[#allocation7 + $0xb0] sm:$0xff]  }
 0x14e   :  { %938 = vmatprep.subr.bf16.mxu0 %v1691_v56  ;;  %1508 = vmatprep.subr.bf16.mxu1 %v1712_v11  ;;  %v1733_v56 = vld [vmem:[#allocation7 + $0xb8] sm:$0xff]  }
 0x151   :  { %939 = vmatpush1.bf16.msra.mxu0 %v1689_v57  ;;  %1509 = vmatpush3.bf16.msra.mxu1 %v1713_v12 }
 0x152   :  { %940 = vmatprep.subr.bf16.mxu0 %v1694_v60  ;;  %1510 = vmatprep.subr.bf16.mxu1 %v1714_v13 }
 0x155   :  { %941 = vmatpush1.bf16.msra.mxu0 %v1692_v62  ;;  %1511 = vmatpush3.bf16.msra.mxu1 %v1715_v14 }
 0x156   :  { %942 = vmatprep.subr.bf16.mxu0 %v1697_v63  ;;  %1512 = vmatprep.subr.bf16.mxu1 %v1716_v15 }
 0x159   :  { %943 = vmatpush1.bf16.msra.mxu0 %v1695_v0  ;;  %1513 = vmatpush3.bf16.msra.mxu1 %v1717_v16 }
 0x15a   :  { %944 = vmatprep.subr.bf16.mxu0 %v1700_v1  ;;  %1514 = vmatprep.subr.bf16.mxu1 %v1718_v17 }
 0x15d   :  { %945 = vmatpush1.bf16.msra.mxu0 %v1698_v2  ;;  %1515 = vmatpush3.bf16.msra.mxu1 %v1719_v18 }
 0x15e   :  { %946 = vmatprep.subr.bf16.mxu0 %v1703_v3  ;;  %1516 = vmatprep.subr.bf16.mxu1 %v1720_v19  ;;  %v1437_v3 = vld [vmem:[%s1976_s6] ss:$0 sm:$0xff] }
 0x161   :  { %947 = vmatpush1.bf16.msra.mxu0 %v1701_v4  ;;  %1517 = vmatpush3.bf16.msra.mxu1 %v1721_v20 }
 0x162   :  { %948 = vmatprep.subr.bf16.mxu0 %v1706_v5  ;;  %1518 = vmatprep.subr.bf16.mxu1 %v1722_v21 }
 0x165   :  { %949 = vmatpush1.bf16.msra.mxu0 %v1704_v6  ;;  %1519 = vmatpush3.bf16.msra.mxu1 %v1723_v22 }
 0x166   :  { %950 = vmatprep.subr.bf16.mxu0 %v1709_v7  ;;  %1520 = vmatprep.subr.bf16.mxu1 %v1724_v23 }
 0x169   :  { %951 = vmatpush1.bf16.msra.mxu0 %v1707_v8  ;;  %1521 = vmatpush3.bf16.msra.mxu1 %v1725_v24 }
 0x16a   :  { %1537 = vmatprep.subr.bf16.mxu1 %v1841_v25 }
 0x16c   :  { %953 = vmatmul.mubr.bf16.vlgmr.msra.gmra.mrb[4].mxu0 %v220_v54  ;;  %v1731_v54 = vld [vmem:[#allocation7 + $0xa8] sm:$0xff]  }
 0x1ff   :  { %v1478_v26 = vpop.f32.mrb[4].mxu1 }
 0x200   :  { %v1479_v27 = vpop.f32.mrb[5].mxu1 }
 0x201   :  { %v1480_v28 = vadd.f32 %v1479_v27, %v1478_v26  ;;  %v1481_v29 = vpop.f32.mrb[6].mxu1 }
 0x202   :  { %v1482_v30 = vpop.f32.mrb[7].mxu1 }
 0x203   :  { %v996_v36 = vadd.f32 %v1480_v28, %v363_v32 }
 0x21f   :  { %v1500_v33 = vpop.f32.mrb[8].mxu1 }
 0x220   :  { %v1501_v34 = vpop.f32.mrb[9].mxu1 }
 0x221   :  { %v1502_v37 = vadd.f32 %v1501_v34, %v1500_v33  ;;  %v1503_v38 = vpop.f32.mrb[10].mxu1 }
 0x222   :  { %v1504_v39 = vpop.f32.mrb[11].mxu1 }
 0x223   :  { %v1036_v40 = vadd.f32 %v1502_v37, %v996_v36 }
 0x225   :  { %v1043_v57 = vmax.f32 %v1036_v40, 0.0 }
 0x227   :  { %v1046_v60 = vpack.c.bf16 %v1043_v57, %v1043_v57 }
 0x23f   :  { %v954_v43 = vpop.f32.mrb[4].mxu0 }
 0x240   :  { %v1557_v44 = vadd.f32 %v954_v43, %v355_v41  ;;  %v956_v45 = vpop.f32.mrb[5].mxu0 }
 0x241   :  { %v1558_v46 = vadd.f32 %v956_v45, %v359_v42  ;;  %v958_v47 = vpop.f32.mrb[6].mxu0 }
 0x242   :  { %v1041_v48 = vmax.f32 %v1557_v44, 0.0  ;;  %v959_v35 = vpop.f32.mrb[7].mxu0 }
 0x243   :  { %v1042_v49 = vmax.f32 %v1558_v46, 0.0 }
 0x244   :  { %v1044_v52 = vpack.c.bf16 %v1041_v48, %v1041_v48 }
 0x245   :  { %v1045_v50 = vpack.c.bf16 %v1042_v49, %v1042_v49 }
 0x247   :  { %1278 = vmatprep.mubr.bf16.mxu1 %v1045_v50 }
 0x248   :  { %1279 = vmatmul.mubr.bf16.vlgmr.msra.gmra.mrb[12].mxu1 %v1044_v52 }
 0x249   :  { %1538 = vmatpush3.bf16.msra.mxu1 %v1726_v51  ;;  %1553 = vmatprep.mubr.msk.bf16.mxu1 %vm1842_vm1, %v1841_v25 }
 0x24a   :  { %1539 = vmatprep.subr.bf16.mxu1 %v1841_v25 }
 0x24d   :  { %1540 = vmatpush3.bf16.msra.mxu1 %v1727_v53 }
 0x24e   :  { %1541 = vmatprep.subr.bf16.mxu1 %v1841_v25 }
 0x251   :  { %1542 = vmatpush3.bf16.msra.mxu1 %v1728_v58 }
 0x252   :  { %1543 = vmatprep.subr.bf16.mxu1 %v1841_v25 }
 0x255   :  { %1544 = vmatpush3.bf16.msra.mxu1 %v1729_v59 }
 0x256   :  { %1545 = vmatprep.subr.bf16.mxu1 %v1841_v25 }
 0x259   :  { %1546 = vmatpush3.bf16.msra.mxu1 %v1730_v61 }
 0x25a   :  { %1547 = vmatprep.subr.bf16.mxu1 %v1841_v25 }
 0x25d   :  { %1548 = vmatpush3.bf16.msra.mxu1 %v1731_v54 }
 0x25e   :  { %1549 = vmatprep.subr.bf16.mxu1 %v1841_v25 }
 0x261   :  { %1550 = vmatpush3.bf16.msra.mxu1 %v1732_v55 }
 0x262   :  { %1551 = vmatprep.subr.bf16.mxu1 %v1841_v25 }
 0x265   :  { %1552 = vmatpush3.bf16.msra.mxu1 %v1733_v56 }
 0x268   :  { %1554 = vmatmul.mubr.bf16.vlgmr.msra.gmra.mrb[16].mxu1 %v1046_v60 }
 0x31b   :  { %v1522_v62 = vpop.f32.mrb[12].mxu1 }
 0x31c   :  { %v1523_v63 = vpop.f32.mrb[13].mxu1 }
 0x31d   :  { %v1524_v0 = vadd.f32 %v1523_v63, %v1522_v62  ;;  %v1525_v1 = vpop.f32.mrb[14].mxu1 }
 0x31e   :  { %v1526_v2 = vpop.f32.mrb[15].mxu1 }
 0x31f   :  { %v1281_v4 = vadd.f32 %v1524_v0, %v1437_v3 }
 0x33b   :  { %v1320_v5 = vpop.f32.mrb[16].mxu1 }
 0x33c   :  { %v1321_v6 = vadd.f32 %v1320_v5, %v1281_v4  ;;  %v1555_v7 = vpop.f32.mrb[17].mxu1 }
 0x33d   :  { %v1323_v8 = vpop.f32.mrb[18].mxu1 }
 0x33e   :  { %1734 = vtanh.f32 %v1321_v6  ;;  %v1556_v9 = vpop.f32.mrb[19].mxu1 }
 0x348   :  { %v1735_v10 = vpop.eup %1734 }
 0x349   :  { %1327 = vst [vmem:[%s1977_s7] sm:$0xff] %v1735_v10 }
 0x34a   :  { %1332 = vsyncpa [#allocation3], 1 }
 0x34b   :  { %1333 = vsyncpa [#allocation5], 1 }
 0x34c   :  { %1334 = vsyncpa [#allocation8], 1 }

</bundles_post_ra>
